<compile_context>
chip_gen: v7x
topology: tpu7x:2x2x1
jax: 0.10.0
libtpu: 0.0.40
codegen_flags: <defaults>
</compile_context>

<pallas_src>
import jax
import jax.numpy as jnp
from jax.experimental import pallas as pl
from jax.experimental.pallas import tpu as pltpu

LANE = 128      # vreg lane width -> last-dim padding target (lane-dense stores)
SUBLANE = 8     # f32 sublane granularity for the token tile


def _round_up(x: int, m: int) -> int:
    return (x + m - 1) // m * m


def _cdiv(a: int, b: int) -> int:
    return -(-a // b)


def _vmem_capacity_bytes() -> int:
    """Best-effort chip VMEM capacity; conservative (v7x) default on failure."""
    try:
        get_info = getattr(pltpu, "get_tpu_info", None)
        if get_info is not None:
            cap = int(getattr(get_info(), "vmem_capacity_bytes", 0))
            if cap > 0:
                return cap
    except Exception:
        pass
    return 64 << 20


def _make_ffn_kernel(d_in: int, no_layer_norm: bool, eps: float):
    """Per-tile kernel body (closes over static config)."""

    def kernel(x_ref, w1_ref, b1_ref, w2_ref, b2_ref, gamma_ref, beta_ref,
               o_ref, acc_ref):
        k = pl.program_id(1)

        @pl.when(k == 0)
        def _():
            acc_ref[...] = jnp.zeros_like(acc_ref)

        # MXU in bf16 (native rate on every generation), f32 accumulate.
        x_bf = x_ref[...].astype(jnp.bfloat16)
        h = jnp.dot(x_bf, w1_ref[...], preferred_element_type=jnp.float32)
        h = jnp.maximum(h + b1_ref[...], 0.0)
        acc_ref[...] += jnp.dot(h.astype(jnp.bfloat16), w2_ref[...],
                                preferred_element_type=jnp.float32)

        @pl.when(k == pl.num_programs(1) - 1)
        def _():
            # dropout: identity in eval mode.
            y = acc_ref[...] + b2_ref[...] + x_ref[...].astype(jnp.float32)
            if no_layer_norm:
                o_ref[...] = y.astype(o_ref.dtype)
            else:
                # LayerNorm over the real feature width d_in.  Padded lanes of
                # y are exactly zero by construction (zero-padded w2/b2 and
                # zero-padded residual), so one pass of sum / sum-of-squares
                # gives exact mean/var with no mask.
                inv_d = jnp.float32(1.0 / d_in)
                mean = jnp.sum(y, axis=-1, keepdims=True) * inv_d
                var = jnp.sum(y * y, axis=-1, keepdims=True) * inv_d - mean * mean
                y_hat = (y - mean) * jax.lax.rsqrt(var + jnp.float32(eps))
                o_ref[...] = (y_hat * gamma_ref[...] + beta_ref[...]).astype(o_ref.dtype)

    return kernel


def make_positionwise_ffn(w1, b1, w2, b2, gamma=None, beta=None, *,
                          no_layer_norm=False, eps=1e-6, tm=None, tk=512):
    """One-time parameter prep; returns apply(x) for x of shape (..., d_in).

    w1: (d_in, d_hid), w2: (d_hid, d_in) -- pre-transposed so the kernel does
    plain x @ W + b on the MXU.
    """
    d_in, d_hid = int(w1.shape[0]), int(w1.shape[1])
    assert w2.shape[0] == d_hid and w2.shape[1] == d_in

    # Chip-derived budgets (v7x: 64 MiB/TC; v5e/v6e: 128 MiB).
    vmem_cap = _vmem_capacity_bytes()
    small_vmem = vmem_cap <= (64 << 20)
    vmem_budget = (56 << 20) if small_vmem else (104 << 20)
    if tm is None:
        tm = 256 if small_vmem else 512
    tm = _round_up(max(int(tm), SUBLANE), SUBLANE)

    # Lane-dense feature padding; hidden dim padded to a multiple of the
    # hidden tile so no k-block ever reads junk weight columns/rows.
    d_in_p = _round_up(d_in, LANE)
    tk_eff = min(_round_up(int(tk), LANE), _round_up(d_hid, LANE))
    d_hid_p = _round_up(d_hid, tk_eff)
    nk = d_hid_p // tk_eff

    # One-time parameter prep (hoisted out of the per-call path): zero-pad and
    # cast matmul weights to bf16; f32 epilogue params stay f32.
    w1_p = jnp.pad(w1, ((0, d_in_p - d_in), (0, d_hid_p - d_hid))).astype(jnp.bfloat16)
    w2_p = jnp.pad(w2, ((0, d_hid_p - d_hid), (0, d_in_p - d_in))).astype(jnp.bfloat16)
    b1_p = jnp.pad(b1.astype(jnp.float32), (0, d_hid_p - d_hid)).reshape(1, d_hid_p)
    b2_p = jnp.pad(b2.astype(jnp.float32), (0, d_in_p - d_in)).reshape(1, d_in_p)
    if gamma is None:
        gamma = jnp.ones((d_in,), jnp.float32)
    if beta is None:
        beta = jnp.zeros((d_in,), jnp.float32)
    g_p = jnp.pad(gamma.astype(jnp.float32), (0, d_in_p - d_in)).reshape(1, d_in_p)
    be_p = jnp.pad(beta.astype(jnp.float32), (0, d_in_p - d_in)).reshape(1, d_in_p)

    kernel = _make_ffn_kernel(d_in, no_layer_norm, eps)

    def apply(x):
        orig_shape = x.shape
        assert int(orig_shape[-1]) == d_in
        x2d = x.reshape(-1, d_in)
        n = int(x2d.shape[0])
        if d_in_p != d_in:
            x2d = jnp.pad(x2d, ((0, 0), (0, d_in_p - d_in)))   # lane padding only

        # Token tile: big, but ensure >= 2 token tiles so both v7x TCs get work.
        tm_eff = min(tm, _round_up(n, SUBLANE))
        while _cdiv(n, tm_eff) < 2 and tm_eff > SUBLANE:
            tm_eff = max(SUBLANE, _round_up(tm_eff // 2, SUBLANE))
        grid = (_cdiv(n, tm_eff), nk)

        x_itemsize = jnp.dtype(x.dtype).itemsize
        vmem_est = (2 * tm_eff * d_in_p * x_itemsize            # x tile (double-buffered)
                    + 2 * tm_eff * d_in_p * x_itemsize          # out tile
                    + tm_eff * d_in_p * 4                       # f32 accumulator
                    + 2 * 2 * d_in_p * tk_eff * 2               # w1 + w2 tiles (bf16, 2 bufs)
                    + tm_eff * tk_eff * (4 + 2)                 # h (f32) + bf16 temp
                    + 2 * 2 * tk_eff * 4 + 3 * d_in_p * 4)      # b1 tiles, b2/gamma/beta
        vmem_limit = int(min(vmem_budget, max(32 << 20, 2 * vmem_est)))

        flops = 4 * n * d_in_p * d_hid_p                        # two matmuls
        bytes_accessed = (2 * n * d_in_p * x_itemsize           # x in + out
                          + grid[0] * 2 * d_in_p * d_hid_p * 2  # streamed bf16 weights
                          + (d_hid_p + 3 * d_in_p) * 4)

        out = pl.pallas_call(
            kernel,
            out_shape=jax.ShapeDtypeStruct((n, d_in_p), x.dtype),
            grid_spec=pltpu.PrefetchScalarGridSpec(
                num_scalar_prefetch=0,
                grid=grid,
                in_specs=[
                    pl.BlockSpec((tm_eff, d_in_p), lambda i, k: (i, 0)),  # x (resident over k)
                    pl.BlockSpec((d_in_p, tk_eff), lambda i, k: (0, k)),  # w1 tile
                    pl.BlockSpec((1, tk_eff), lambda i, k: (0, k)),       # b1 tile
                    pl.BlockSpec((tk_eff, d_in_p), lambda i, k: (k, 0)),  # w2 tile
                    pl.BlockSpec((1, d_in_p), lambda i, k: (0, 0)),       # b2
                    pl.BlockSpec((1, d_in_p), lambda i, k: (0, 0)),       # gamma
                    pl.BlockSpec((1, d_in_p), lambda i, k: (0, 0)),       # beta
                ],
                out_specs=pl.BlockSpec((tm_eff, d_in_p), lambda i, k: (i, 0)),
                scratch_shapes=[pltpu.VMEM((tm_eff, d_in_p), jnp.float32)],
            ),
            compiler_params=pltpu.CompilerParams(
                dimension_semantics=("parallel", "arbitrary"),
                vmem_limit_bytes=vmem_limit),
            cost_estimate=pl.CostEstimate(
                flops=flops, transcendentals=n, bytes_accessed=bytes_accessed),
        )(x2d, w1_p, b1_p, w2_p, b2_p, g_p, be_p)

        if d_in_p != d_in:
            out = out[:, :d_in]
        return out.reshape(orig_shape)

    return apply


def reference(x, w1, b1, w2, b2, gamma, beta, eps=1e-6):
    residual = x
    h = jnp.maximum(x @ w1 + b1, 0.0)
    y = h @ w2 + b2 + residual
    mean = jnp.mean(y, axis=-1, keepdims=True)
    var = jnp.mean((y - mean) ** 2, axis=-1, keepdims=True)
    return (y - mean) / jnp.sqrt(var + eps) * gamma + beta


if __name__ == "__main__":
    # Shapes implied by the module: x [batch, seq, d_in]; d_hid hidden width.
    batch, seq, d_in, d_hid = 2, 8, 32, 64

    key = jax.random.PRNGKey(0)
    kx, k1, k2, kb1, kb2, kx2 = jax.random.split(key, 6)

    x = jax.random.normal(kx, (batch, seq, d_in), dtype=jnp.float32)

    # Deterministic parameter init (nn.Linear-like uniform bounds); weights
    # stored as (in, out) so the kernel computes x @ W + b directly.
    lim1 = 1.0 / (d_in ** 0.5)
    lim2 = 1.0 / (d_hid ** 0.5)
    w1 = jax.random.uniform(k1, (d_in, d_hid), jnp.float32, -lim1, lim1)
    b1 = jax.random.uniform(kb1, (d_hid,), jnp.float32, -lim1, lim1)
    w2 = jax.random.uniform(k2, (d_hid, d_in), jnp.float32, -lim2, lim2)
    b2 = jax.random.uniform(kb2, (d_in,), jnp.float32, -lim2, lim2)
    gamma = jnp.ones((d_in,), jnp.float32)   # nn.LayerNorm default init
    beta = jnp.zeros((d_in,), jnp.float32)

    # bf16 MXU operands vs f32 reference -> looser tolerance (~1e-2 scale).
    ATOL = RTOL = 3e-2

    ffn = make_positionwise_ffn(w1, b1, w2, b2, gamma, beta)
    out = jax.block_until_ready(ffn(x))
    ref = reference(x, w1, b1, w2, b2, gamma, beta)
    assert out.shape == x.shape
    assert jnp.allclose(out, ref, atol=ATOL, rtol=RTOL), "mismatch vs reference"

    # Ragged token count (exercises the unpadded-token tail path).
    x2 = jax.random.normal(kx2, (3, 5, d_in), dtype=jnp.float32)
    out2 = jax.block_until_ready(ffn(x2))
    ref2 = reference(x2, w1, b1, w2, b2, gamma, beta)
    assert out2.shape == x2.shape
    assert jnp.allclose(out2, ref2, atol=ATOL, rtol=RTOL), "mismatch vs reference (ragged)"

    # no_layer_norm variant.
    ffn_noln = make_positionwise_ffn(w1, b1, w2, b2, no_layer_norm=True)
    out3 = jax.block_until_ready(ffn_noln(x))
    ref3 = x + jnp.maximum(x @ w1 + b1, 0.0) @ w2 + b2
    assert jnp.allclose(out3, ref3, atol=ATOL, rtol=RTOL), "mismatch vs reference (no LN)"

    print("KERNEL_OK")
</pallas_src>

<mosaic_0001>
module attributes {stable_mosaic.version = 11 : i64} {
  func.func @kernel(%arg0: i32, %arg1: i32, %arg2: memref<8x128xf32, #tpu.memory_space<vmem>>, %arg3: memref<128x128xbf16, #tpu.memory_space<vmem>>, %arg4: memref<1x128xf32, #tpu.memory_space<vmem>>, %arg5: memref<128x128xbf16, #tpu.memory_space<vmem>>, %arg6: memref<1x128xf32, #tpu.memory_space<vmem>>, %arg7: memref<1x128xf32, #tpu.memory_space<vmem>>, %arg8: memref<1x128xf32, #tpu.memory_space<vmem>>, %arg9: memref<8x128xf32, #tpu.memory_space<vmem>>, %arg10: memref<8x128xf32, #tpu.memory_space<vmem>>) attributes {dimension_semantics = [#tpu.dimension_semantics<parallel>, #tpu.dimension_semantics<arbitrary>], iteration_bounds = array<i64: 2, 1>, scalar_prefetch = 0 : i64, scratch_operands = 1 : i64, tpu.core_type = #tpu.core_type<tc>, window_params = [{transform_indices = @transform_0, window_bounds = array<i64: 8, 128>}, {transform_indices = @transform_1, window_bounds = array<i64: 128, 128>}, {transform_indices = @transform_2, window_bounds = array<i64: 1, 128>}, {transform_indices = @transform_3, window_bounds = array<i64: 128, 128>}, {pipeline_mode = #tpu.pipeline_mode<synchronous>, transform_indices = @transform_4, window_bounds = array<i64: 1, 128>}, {pipeline_mode = #tpu.pipeline_mode<synchronous>, transform_indices = @transform_5, window_bounds = array<i64: 1, 128>}, {pipeline_mode = #tpu.pipeline_mode<synchronous>, transform_indices = @transform_6, window_bounds = array<i64: 1, 128>}, {transform_indices = @transform_7, window_bounds = array<i64: 8, 128>}]} {
    %c0_i32 = arith.constant 0 : i32
    %0 = arith.cmpi eq, %arg1, %c0_i32 : i32
    %1 = arith.extui %0 : i1 to i32
    %c0_i32_0 = arith.constant 0 : i32
    %2 = arith.cmpi ne, %1, %c0_i32_0 : i32
    scf.if %2 {
      %cst_16 = arith.constant 0.000000e+00 : f32
      %21 = vector.broadcast %cst_16 : f32 to vector<8x128xf32>
      %c0_17 = arith.constant 0 : index
      %c0_18 = arith.constant 0 : index
      %22 = vector.load %arg10[%c0_17, %c0_18] : memref<8x128xf32, #tpu.memory_space<vmem>>, vector<8x128xf32>
      tpu.vector_store %arg10[%c0_17, %c0_18], %21 {strides = array<i32>} : memref<8x128xf32, #tpu.memory_space<vmem>>, vector<8x128xf32>,
    } else {
    }
    %c0 = arith.constant 0 : index
    %c0_1 = arith.constant 0 : index
    %3 = vector.load %arg2[%c0, %c0_1] : memref<8x128xf32, #tpu.memory_space<vmem>>, vector<8x128xf32>
    %4 = arith.truncf %3 : vector<8x128xf32> to vector<8x128xbf16>
    %c0_2 = arith.constant 0 : index
    %c0_3 = arith.constant 0 : index
    %5 = vector.load %arg3[%c0_2, %c0_3] : memref<128x128xbf16, #tpu.memory_space<vmem>>, vector<128x128xbf16>
    %cst = arith.constant dense<0.000000e+00> : vector<8x128xf32>
    %6 = tpu.matmul %4, %5, %cst {dimension_numbers = #tpu.dot_dimension_numbers<[1], [0], [0], [1], [0, 0, 1, 1], [], []>} : vector<8x128xbf16>, vector<128x128xbf16>, vector<8x128xf32> -> vector<8x128xf32>
    %c0_4 = arith.constant 0 : index
    %c0_5 = arith.constant 0 : index
    %7 = vector.load %arg4[%c0_4, %c0_5] : memref<1x128xf32, #tpu.memory_space<vmem>>, vector<1x128xf32>
    %8 = vector.broadcast %7 : vector<1x128xf32> to vector<8x128xf32>
    %9 = arith.addf %6, %8 : vector<8x128xf32>
    %cst_6 = arith.constant 0.000000e+00 : f32
    %10 = vector.broadcast %cst_6 : f32 to vector<8x128xf32>
    %11 = arith.maximumf %9, %10 : vector<8x128xf32>
    %c0_7 = arith.constant 0 : index
    %c0_8 = arith.constant 0 : index
    %12 = vector.load %arg10[%c0_7, %c0_8] : memref<8x128xf32, #tpu.memory_space<vmem>>, vector<8x128xf32>
    %13 = arith.truncf %11 : vector<8x128xf32> to vector<8x128xbf16>
    %c0_9 = arith.constant 0 : index
    %c0_10 = arith.constant 0 : index
    %14 = vector.load %arg5[%c0_9, %c0_10] : memref<128x128xbf16, #tpu.memory_space<vmem>>, vector<128x128xbf16>
    %cst_11 = arith.constant dense<0.000000e+00> : vector<8x128xf32>
    %15 = tpu.matmul %13, %14, %cst_11 {dimension_numbers = #tpu.dot_dimension_numbers<[1], [0], [0], [1], [0, 0, 1, 1], [], []>} : vector<8x128xbf16>, vector<128x128xbf16>, vector<8x128xf32> -> vector<8x128xf32>
    %16 = arith.addf %12, %15 : vector<8x128xf32>
    %c0_12 = arith.constant 0 : index
    %c0_13 = arith.constant 0 : index
    %17 = vector.load %arg10[%c0_12, %c0_13] : memref<8x128xf32, #tpu.memory_space<vmem>>, vector<8x128xf32>
    tpu.vector_store %arg10[%c0_12, %c0_13], %16 {strides = array<i32>} : memref<8x128xf32, #tpu.memory_space<vmem>>, vector<8x128xf32>,
    %c0_i32_14 = arith.constant 0 : i32
    %18 = arith.cmpi eq, %arg1, %c0_i32_14 : i32
    %19 = arith.extui %18 : i1 to i32
    %c0_i32_15 = arith.constant 0 : i32
    %20 = arith.cmpi ne, %19, %c0_i32_15 : i32
    scf.if %20 {
      %c0_16 = arith.constant 0 : index
      %c0_17 = arith.constant 0 : index
      %21 = vector.load %arg10[%c0_16, %c0_17] : memref<8x128xf32, #tpu.memory_space<vmem>>, vector<8x128xf32>
      %c0_18 = arith.constant 0 : index
      %c0_19 = arith.constant 0 : index
      %22 = vector.load %arg6[%c0_18, %c0_19] : memref<1x128xf32, #tpu.memory_space<vmem>>, vector<1x128xf32>
      %23 = vector.broadcast %22 : vector<1x128xf32> to vector<8x128xf32>
      %24 = arith.addf %21, %23 : vector<8x128xf32>
      %c0_20 = arith.constant 0 : index
      %c0_21 = arith.constant 0 : index
      %25 = vector.load %arg2[%c0_20, %c0_21] : memref<8x128xf32, #tpu.memory_space<vmem>>, vector<8x128xf32>
      %26 = arith.addf %24, %25 : vector<8x128xf32>
      %cst_22 = arith.constant dense<0.000000e+00> : vector<8xf32>
      %27 = vector.multi_reduction <add>, %26, %cst_22 [1] : vector<8x128xf32> to vector<8xf32>
      %28 = vector.shape_cast %27 : vector<8xf32> to vector<8x1xf32>
      %cst_23 = arith.constant 3.125000e-02 : f32
      %29 = vector.broadcast %cst_23 : f32 to vector<8x1xf32>
      %30 = arith.mulf %28, %29 : vector<8x1xf32>
      %31 = arith.mulf %26, %26 : vector<8x128xf32>
      %cst_24 = arith.constant dense<0.000000e+00> : vector<8xf32>
      %32 = vector.multi_reduction <add>, %31, %cst_24 [1] : vector<8x128xf32> to vector<8xf32>
      %33 = vector.shape_cast %32 : vector<8xf32> to vector<8x1xf32>
      %cst_25 = arith.constant 3.125000e-02 : f32
      %34 = vector.broadcast %cst_25 : f32 to vector<8x1xf32>
      %35 = arith.mulf %33, %34 : vector<8x1xf32>
      %36 = arith.mulf %30, %30 : vector<8x1xf32>
      %37 = arith.subf %35, %36 : vector<8x1xf32>
      %38 = vector.broadcast %30 : vector<8x1xf32> to vector<8x128xf32>
      %39 = arith.subf %26, %38 : vector<8x128xf32>
      %cst_26 = arith.constant 9.99999997E-7 : f32
      %40 = vector.broadcast %cst_26 : f32 to vector<8x1xf32>
      %41 = arith.addf %37, %40 : vector<8x1xf32>
      %42 = math.rsqrt %41 : vector<8x1xf32>
      %43 = vector.broadcast %42 : vector<8x1xf32> to vector<8x128xf32>
      %44 = arith.mulf %39, %43 : vector<8x128xf32>
      %c0_27 = arith.constant 0 : index
      %c0_28 = arith.constant 0 : index
      %45 = vector.load %arg7[%c0_27, %c0_28] : memref<1x128xf32, #tpu.memory_space<vmem>>, vector<1x128xf32>
      %46 = vector.broadcast %45 : vector<1x128xf32> to vector<8x128xf32>
      %47 = arith.mulf %44, %46 : vector<8x128xf32>
      %c0_29 = arith.constant 0 : index
      %c0_30 = arith.constant 0 : index
      %48 = vector.load %arg8[%c0_29, %c0_30] : memref<1x128xf32, #tpu.memory_space<vmem>>, vector<1x128xf32>
      %49 = vector.broadcast %48 : vector<1x128xf32> to vector<8x128xf32>
      %50 = arith.addf %47, %49 : vector<8x128xf32>
      %c0_31 = arith.constant 0 : index
      %c0_32 = arith.constant 0 : index
      %51 = vector.load %arg9[%c0_31, %c0_32] : memref<8x128xf32, #tpu.memory_space<vmem>>, vector<8x128xf32>
      tpu.vector_store %arg9[%c0_31, %c0_32], %50 {strides = array<i32>} : memref<8x128xf32, #tpu.memory_space<vmem>>, vector<8x128xf32>,
    } else {
    }
    return
  }
  func.func @transform_0(%arg0: i32, %arg1: i32) -> (i32, i32) {
    %c0_i32 = arith.constant 0 : i32
    %c0_i32_0 = arith.constant 0 : i32
    return %arg0, %c0_i32 : i32, i32
  }
  func.func @transform_1(%arg0: i32, %arg1: i32) -> (i32, i32) {
    %c0_i32 = arith.constant 0 : i32
    %c0_i32_0 = arith.constant 0 : i32
    return %c0_i32, %arg1 : i32, i32
  }
  func.func @transform_2(%arg0: i32, %arg1: i32) -> (i32, i32) {
    %c0_i32 = arith.constant 0 : i32
    %c0_i32_0 = arith.constant 0 : i32
    return %c0_i32, %arg1 : i32, i32
  }
  func.func @transform_3(%arg0: i32, %arg1: i32) -> (i32, i32) {
    %c0_i32 = arith.constant 0 : i32
    %c0_i32_0 = arith.constant 0 : i32
    return %arg1, %c0_i32 : i32, i32
  }
  func.func @transform_4(%arg0: i32, %arg1: i32) -> (i32, i32) {
    %c0_i32 = arith.constant 0 : i32
    %c0_i32_0 = arith.constant 0 : i32
    %c0_i32_1 = arith.constant 0 : i32
    return %c0_i32, %c0_i32_0 : i32, i32
  }
  func.func @transform_5(%arg0: i32, %arg1: i32) -> (i32, i32) {
    %c0_i32 = arith.constant 0 : i32
    %c0_i32_0 = arith.constant 0 : i32
    %c0_i32_1 = arith.constant 0 : i32
    return %c0_i32, %c0_i32_0 : i32, i32
  }
  func.func @transform_6(%arg0: i32, %arg1: i32) -> (i32, i32) {
    %c0_i32 = arith.constant 0 : i32
    %c0_i32_0 = arith.constant 0 : i32
    %c0_i32_1 = arith.constant 0 : i32
    return %c0_i32, %c0_i32_0 : i32, i32
  }
  func.func @transform_7(%arg0: i32, %arg1: i32) -> (i32, i32) {
    %c0_i32 = arith.constant 0 : i32
    %c0_i32_0 = arith.constant 0 : i32
    return %arg0, %c0_i32 : i32, i32
  }
}

</mosaic_0001>

<bundles_post_ra>
// kernel: tpu_custom_call.1
= control target key start
LH: loop header
LB: loop body
LE: loop exit
PB: predicated region body
PF: predicated region fallthrough
CT: control target
= control target key end

     0   :  { %12 = vsyncpa [#allocation4], 0  ;;  %s1456_s0 = inlined_call_operand.hbm [shape: f32[16,128], index: 0, kind: input, shape index: {}]   ;;  %s1457_s1 = inlined_call_operand.hbm [shape: bf16[128,128], index: 1, kind: input, shape index: {}]   ;;  %s1458_s2 = inlined_call_operand.vmem [shape: f32[1,128], index: 2, kind: input, shape index: {}]   ;;  %s1459_s3 = inlined_call_operand.hbm [shape: bf16[128,128], index: 3, kind: input, shape index: {}]   ;;  %s1460_s4 = inlined_call_operand.vmem [shape: f32[1,128], index: 4, kind: input, shape index: {}]   ;;  %s1461_s5 = inlined_call_operand.vmem [shape: f32[1,128], index: 5, kind: input, shape index: {}]   ;;  %s1462_s6 = inlined_call_operand.vmem [shape: f32[1,128], index: 6, kind: input, shape index: {}]   ;;  %s1463_s7 = inlined_call_operand.hbm [shape: f32[16,128], index: 7, kind: output, shape index: {}]  }
   0x1   :  { %14 = vsyncpa [#allocation4 + $0x1], 0 }
   0x2   :  { %15 = vsyncpa [#allocation7], 0 }
   0x3   :  { %16 = vsyncpa [#allocation5], 0 }
   0x4   :  { %18 = vsyncpa [#allocation5 + $0x1], 0  ;;  %s1187_s24 = smov 0   ;;  %s1189_s25 = smov 0  }
   0x5   :  { %s1191_s26 = smov 0   ;;  %s1193_s27 = smov 0  }
   0x6   :  { %s1195_s28 = smov 0   ;;  %s1197_s29 = smov 0  }
   0x7 LB: > { %1470 = sst [smem:[#allocation13_spill]] %s1117_s24  ;;  %s764_s30 = sadd.s32 4294967295, %s1137_s29   ;;  %s1137_s29 = sphi %s1197_s29, %s24_s29   ;;  %s1133_s28 = sphi %s1195_s28, %s1491_s28   ;;  %s1129_s27 = sphi %s1193_s27, %s1490_s27   ;;  %s1125_s26 = sphi %s1191_s26, %s1489_s26   ;;  %s1121_s25 = sphi %s1189_s25, %s1488_s25   ;;  %s1117_s24 = sphi %s1187_s24, %s1487_s24  }
   0x8   : > { %s765_s8 = sadd.s32 4294967294, %s1137_s29   ;;  %p56_p0 = scmp.ne.s32.totalorder %s1121_s25, %s1117_s24 }
   0x9   : > { %p1221_p1 = scmp.eq.s32.totalorder %s764_s30, 0  ;;  %p1225_p2 = scmp.eq.s32.totalorder %s764_s30, 1 }
   0xa   : > { %p227_p3 = scmp.eq.s32.totalorder %s765_s8, 1  ;;  %p766_p5 = scmp.ge.s32.totalorder %s1137_s29, 1 }
   0xb   : > { %s1471_s9 = scalar_select %p1221_p1, 1, 0 }
   0xc   : > { %p1231_p4 = por %p1221_p1, %p56_p0  ;;  %p1236_p6 = por %p227_p3, %p56_p0 }
   0xd   : > { %p234_p7 = scmp.lt.s32.totalorder %s1137_s29, 3  ;;  %s1139_s14 = smov [#allocation6]  }
   0xe   : > { %s1473_s11 = scalar_select %p1231_p4, 1, 0 }
   0xf   : > { %s1474_s12 = scalar_select %p1236_p6, 1, 0 }
  0x10   : > { %p1241_p8 = pnand %p766_p5, %p234_p7  ;;  %s248_s15 = sshll.u32 %s1139_s14, 4  ;;  %s1245_s15 = int_to_ptr.vmem [resolvable:$true] %s248_s15 }
  0x11   : > { %1475 = sst [smem:[#allocation14_spill]] %s1474_s12  ;;  %s1140_s17 = smov [#allocation8]  }
  0x12   : > { %p872_p9 = pneg %p1241_p8  ;;  %s270_s18 = sshll.u32 %s1140_s17, 4  ;;  %s1256_s18 = int_to_ptr.vmem [resolvable:$true] %s270_s18 }
  0x13   : > { %s965_s21 = scalar_lea.hbm %s1457_s1, 1024 }
  0x14   : > { %p1252_p11 = pnand %p872_p9, %p1221_p1  ;;  %p966_p12 = scmp.ne.s32.totalorder %s1457_s1, %s965_s21 }
  0x15   : > { %p972_p5 = scmp.lt.u32.totalorder %s965_s21, %s1457_s1 }
  0x16   : > { %p967_p13 = pneg %p1252_p11 }
  0x18   : > { %p968_p0 = pnand %p967_p13, %p966_p12 }
  0x1a   : > { %p969_p3 = pneg %p968_p0 }
  0x1c   : > { %p974_p7 = pnand %p972_p5, %p969_p3 }
  0x1e   : > { %977 = shalt.err (!%p974_p7)
}
  0x1f   : > { %s978_s14 = scalar_lea.vmem %s1245_s15, 1024  ;;  %p986_p1 = scmp.lt.s32.totalorder %s1245_s15, %s1245_s15 }
  0x20   : > { %p979_p9 = scmp.ne.s32.totalorder %s1245_s15, %s978_s14  ;;  %p987_p12 = scmp.lt.s32.totalorder %s978_s14, %s978_s14 }
  0x22   : > { %p981_p10 = pnand %p979_p9, %p967_p13  ;;  %p988_p0 = por %p987_p12, %p986_p1 }
  0x24   : > { %p982_p6 = pneg %p981_p10 }
  0x26   : > { %p989_p4 = pnand %p988_p0, %p982_p6 }
  0x28   : > { %992 = shalt.err (!%p989_p4)
}
  0x29   : > { %s1141_s17 = smov 64   ;;  %s1142_s19 = smov 4  }
  0x2a   : > { %875 = dma.hbm_to_vmem [thread:$0]  (!%p1252_p11), %s1457_s1, 1024, %s1245_s15, [#allocation7], %s1141_s17, %s1141_s17, %s1142_s19  }
  0x2b   : > { %s993_s30 = scalar_lea.hbm %s1459_s3, 1024 }
  0x2c   : > { %p994_p1 = scmp.ne.s32.totalorder %s1459_s3, %s993_s30  ;;  %p1000_p10 = scmp.lt.u32.totalorder %s993_s30, %s1459_s3 }
  0x2e   : > { %p996_p4 = pnand %p994_p1, %p967_p13 }
  0x30   : > { %p997_p6 = pneg %p996_p4 }
  0x32   : > { %p1002_p3 = pnand %p1000_p10, %p997_p6 }
  0x34   : > { %1005 = shalt.err (!%p1002_p3)
}
  0x35   : > { %s1006_s15 = scalar_lea.vmem %s1256_s18, 1024  ;;  %p1014_p12 = scmp.lt.s32.totalorder %s1256_s18, %s1256_s18 }
  0x36   : > { %p1007_p5 = scmp.ne.s32.totalorder %s1256_s18, %s1006_s15  ;;  %p1015_p0 = scmp.lt.s32.totalorder %s1006_s15, %s1006_s15 }
  0x38   : > { %p1009_p7 = pnand %p1007_p5, %p967_p13  ;;  %p1016_p1 = por %p1015_p0, %p1014_p12 }
  0x3a   : > { %p1010_p9 = pneg %p1009_p7 }
  0x3c   : > { %p1017_p4 = pnand %p1016_p1, %p1010_p9 }
  0x3e   : > { %1020 = shalt.err (!%p1017_p4)
}
  0x3f   : > { %878 = dma.hbm_to_vmem [thread:$0]  (!%p1252_p11), %s1459_s3, 1024, %s1256_s18, [#allocation7], %s1141_s17, %s1141_s17, %s1142_s19  }
  0x40   : > { %s36_s20 = sadd.s32 1, %s1133_s28  ;;  %s43_s21 = sadd.s32 1, %s1125_s26 }
  0x41   : > { %p38_p13 = scmp.ge.s32.totalorder %s36_s20, 2  ;;  %p50_p6 = scmp.ne.s32.totalorder %s1125_s26, %s1121_s25 }
  0x42   : > { %p51_p10 = scmp.eq.s32.totalorder %s1137_s29, 0  ;;  %p889_p3 = scmp.lt.s32.totalorder %s1137_s29, 2 }
  0x43   : > { %s1493_s20 = smov (%p38_p13, %s36_s20), 0  ;;  %p1320_p7 = por %p1225_p2, %p50_p6 }
  0x44   : > { %p52_p5 = por %p51_p10, %p50_p6  ;;  %s40_s22 = ssub.s32 %s1133_s28, %s1493_s20 }
  0x45   : > { %s1478_s16 = scalar_select %p1320_p7, 1, 0 }
  0x46   : > { %s293_s23 = sand.u32 1, %s1125_s26   ;;  %p41_p9 = scmp.eq.s32.totalorder %s40_s22, 0 }
  0x47   : > { %s771_s18 = sshll.u32 %s293_s23, 3  ;;  %s772_s17 = sshll.u32 %s1133_s28, 7 }
  0x48   : > { %s1329_s19 = scalar_select %p41_p9, %s1125_s26, %s43_s21  }
  0x49   : > { %s1334_s14 = scalar_lea.hbm %s1456_s0, %s772_s17  ;;  %s297_s10 = scalar_lea.vmem [#allocation3], %s771_s18 }
  0x4a   : > { %s304_s15 = sshll.u32 %s297_s10, 4  ;;  %p1338_p2 = pnand %p889_p3, %p52_p5  ;;  %s1342_s15 = int_to_ptr.vmem [resolvable:$true] %s304_s15 }
  0x4b   : > { %s294_s12 = scalar_lea.sflag [#allocation4], %s293_s23  ;;  %s1021_s21 = scalar_lea.hbm %s1334_s14, 128 }
  0x4c   : > { %p1022_p11 = scmp.ne.s32.totalorder %s1334_s14, %s1021_s21  ;;  %p1023_p12 = pneg %p1338_p2 }
  0x4d   : > { %s1026_s17 = scalar_lea.hbm %s1456_s0, 256  ;;  %p1027_p4 = scmp.lt.u32.totalorder %s1334_s14, %s1456_s0 }
  0x4e   : > { %p1024_p0 = pnand %p1023_p12, %p1022_p11  ;;  %p1028_p13 = scmp.lt.u32.totalorder %s1026_s17, %s1021_s21 }
  0x4f   : > { %p1030_p10 = scmp.lt.u32.totalorder %s1021_s21, %s1334_s14 }
  0x50   : > { %p1025_p1 = pneg %p1024_p0  ;;  %p1029_p6 = por %p1028_p13, %p1027_p4 }
  0x52   : > { %p1031_p3 = por %p1030_p10, %p1029_p6 }
  0x54   : > { %p1032_p5 = pnand %p1031_p3, %p1025_p1 }
  0x56   : > { %1035 = shalt.err (!%p1032_p5)
}
  0x57   : > { %s1036_s23 = scalar_lea.vmem %s1342_s15, 128  ;;  %s1143_s10 = smov [#allocation3]  }
  0x58   : > { %p1037_p9 = scmp.ne.s32.totalorder %s1342_s15, %s1036_s23  ;;  %s1041_s22 = sshll.u32 %s1143_s10, 4  ;;  %s1042_s22 = int_to_ptr.vmem [resolvable:$false] %s1041_s22 }
  0x59   : > { %s1043_s18 = scalar_lea.vmem %s1042_s22, 256  ;;  %p1044_p7 = scmp.lt.s32.totalorder %s1342_s15, %s1042_s22 }
  0x5a   : > { %p1039_p11 = pnand %p1037_p9, %p1023_p12  ;;  %p1045_p4 = scmp.lt.s32.totalorder %s1043_s18, %s1036_s23 }
  0x5c   : > { %p1040_p0 = pneg %p1039_p11  ;;  %p1046_p13 = por %p1045_p4, %p1044_p7 }
  0x5e   : > { %p1047_p6 = pnand %p1046_p13, %p1040_p0 }
  0x60   : > { %1050 = shalt.err (!%p1047_p6)
}
  0x61   : > { %882 = dma.hbm_to_vmem [thread:$0]  (!%p1338_p2), %s1334_s14, 128, %s1342_s15, %s294_s12  }
  0x62   : > { %313 = sbr.rel (%p1241_p8) target bundleno = 760 (0x2f8), region = 48  ;;  %s1372_s21 = sand.u32 (!%p1241_p8), 1, %s1121_s25  }
  0x63   : > { %s774_s17 = sshll.u32 (!%p1241_p8), %s1372_s21, 3  ;;  %s316_s30 = scalar_lea.sflag (!%p1241_p8), [#allocation4], %s1372_s21 }
  0x64   : > { %s1378_s8 = scalar_lea.vmem (!%p1241_p8), [#allocation3], %s774_s17  ;;  %p1480_p7 = scmp.ne.s32.totalorder (!%p1241_p8), %s1473_s11, 0 }
  0x69   : > { %1104 = dma.done.wait (%p1480_p7), %s316_s30, 128  }
  0x6a   : > { %1106 = vsyncadd (%p1480_p7), %s316_s30, 4294967168  ;;  %p1481_p2 = scmp.ne.s32.totalorder %s1471_s9, 0 }
  0x6c   : > { %1108 = dma.done.wait (%p1481_p2), [#allocation7], 2048  }
  0x6d   : > { %1110 = vsyncadd (%p1481_p2), [#allocation7], 4294965248  ;;  %v1144_v0 = vmov 0.0   ;;  %vm1145_vm0 = vmmov 0   ;;  %v947_v1 = vld [vmem:[#allocation6] sm:$0xff]   ;;  %v948_v2 = vld [vmem:[#allocation6 + $0x8] sm:$0xff]  }
  0x6e   : > { %820 = vmatprep.subr.bf16.mxu0 %v1144_v0  ;;  %836 = vmatprep.mubr.msk.bf16.mxu0 %vm1145_vm0, %v1144_v0  ;;  %v949_v3 = vld [vmem:[#allocation6 + $0x10] sm:$0xff]   ;;  %v955_v4 = vld [vmem:[#allocation8] sm:$0xff]   ;;  %v950_v5 = vld [vmem:[#allocation6 + $0x18] sm:$0xff]   ;;  %s799_s10 = sshll.u32 %s1129_s27, 7  ;;  %s360_s22 = scalar_lea.vmem [#allocation9], %s774_s17 }
  0x6f   : > { %840 = vmatprep.subr.bf16.mxu1 %v1144_v0  ;;  %856 = vmatprep.mubr.msk.bf16.mxu1 %vm1145_vm0, %v1144_v0  ;;  %v956_v6 = vld [vmem:[#allocation8 + $0x8] sm:$0xff]   ;;  %v951_v7 = vld [vmem:[#allocation6 + $0x20] sm:$0xff]   ;;  %v957_v8 = vld [vmem:[#allocation8 + $0x10] sm:$0xff]   ;;  %s651_s18 = sshll.u32 %s360_s22, 4  ;;  %s1407_s9 = scalar_lea.hbm %s1463_s7, %s799_s10  ;;  %s1409_s18 = int_to_ptr.vmem [resolvable:$true] %s651_s18 }
  0x70   : > { %821 = vmatpush3.bf16.msra.mxu0 %v947_v1  ;;  %841 = vmatpush3.bf16.msra.mxu1 %v955_v4  ;;  %v952_v9 = vld [vmem:[#allocation6 + $0x28] sm:$0xff]   ;;  %v958_v10 = vld [vmem:[#allocation8 + $0x18] sm:$0xff]   ;;  %v953_v11 = vld [vmem:[#allocation6 + $0x30] sm:$0xff]   ;;  %s638_s11 = scalar_lea.sflag [#allocation5], %s1372_s21  ;;  %s1051_s13 = scalar_lea.vmem %s1409_s18, 128 }
  0x71   : > { %822 = vmatprep.subr.bf16.mxu0 %v1144_v0  ;;  %842 = vmatprep.subr.bf16.mxu1 %v1144_v0  ;;  %v959_v12 = vld [vmem:[#allocation8 + $0x20] sm:$0xff]   ;;  %v954_v13 = vld [vmem:[#allocation6 + $0x38] sm:$0xff]   ;;  %v960_v15 = vld [vmem:[#allocation8 + $0x28] sm:$0xff]   ;;  %p1052_p8 = scmp.ne.s32.totalorder %s1409_s18, %s1051_s13  ;;  %p1482_p12 = scmp.ne.s32.totalorder %s1478_s16, 0 }
  0x72   : > { %v371_v14 = vld [vmem:[%s1378_s8] sm:$0xff]  ;;  %s1146_s27 = smov [#allocation9]  }
  0x73   : > { %v372_v16 = vpack.c.bf16 %v371_v14, %v371_v14  ;;  %v961_v17 = vld [vmem:[#allocation8 + $0x30] sm:$0xff]   ;;  %v962_v18 = vld [vmem:[#allocation8 + $0x38] sm:$0xff]   ;;  %p1053_p1 = pnand %p1052_p8, %p1482_p12  ;;  %s1055_s17 = sshll.u32 %s1146_s27, 4  ;;  %s1056_s17 = int_to_ptr.vmem [resolvable:$false] %s1055_s17 }
  0x74   : > { %823 = vmatpush3.bf16.msra.mxu0 %v948_v2  ;;  %843 = vmatpush3.bf16.msra.mxu1 %v956_v6  ;;  %v778_v19 = vld [vmem:[%s1458_s2] ss:$0 sm:$0xff]  ;;  %s1057_s14 = scalar_lea.vmem %s1056_s17, 256  ;;  %p1058_p3 = scmp.lt.s32.totalorder %s1409_s18, %s1056_s17 }
  0x75   : > { %824 = vmatprep.subr.bf16.mxu0 %v1144_v0  ;;  %844 = vmatprep.subr.bf16.mxu1 %v1144_v0  ;;  %v795_v27 = vld [vmem:[%s1460_s4] ss:$0 sm:$0xff]  ;;  %p1054_p10 = pneg %p1053_p1  ;;  %p1059_p5 = scmp.lt.s32.totalorder %s1057_s14, %s1051_s13 }
  0x76   : > { %v796_v44 = vld [vmem:[%s1461_s5] ss:$0 sm:$0xff] }
  0x77   : > { %v797_v46 = vld [vmem:[%s1462_s6] ss:$0 sm:$0xff]  ;;  %p1060_p9 = por %p1059_p5, %p1058_p3 }
  0x78   : > { %825 = vmatpush3.bf16.msra.mxu0 %v949_v3  ;;  %845 = vmatpush3.bf16.msra.mxu1 %v957_v8 }
  0x79   : > { %826 = vmatprep.subr.bf16.mxu0 %v1144_v0  ;;  %846 = vmatprep.subr.bf16.mxu1 %v1144_v0  ;;  %p1061_p11 = pnand %p1060_p9, %p1054_p10 }
  0x7c   : > { %827 = vmatpush3.bf16.msra.mxu0 %v950_v5  ;;  %847 = vmatpush3.bf16.msra.mxu1 %v958_v10 }
  0x7d   : > { %828 = vmatprep.subr.bf16.mxu0 %v1144_v0  ;;  %848 = vmatprep.subr.bf16.mxu1 %v1144_v0 }
  0x80   : > { %829 = vmatpush3.bf16.msra.mxu0 %v951_v7  ;;  %849 = vmatpush3.bf16.msra.mxu1 %v959_v12 }
  0x81   : > { %830 = vmatprep.subr.bf16.mxu0 %v1144_v0  ;;  %850 = vmatprep.subr.bf16.mxu1 %v1144_v0 }
  0x84   : > { %831 = vmatpush3.bf16.msra.mxu0 %v952_v9  ;;  %851 = vmatpush3.bf16.msra.mxu1 %v960_v15 }
  0x85   : > { %832 = vmatprep.subr.bf16.mxu0 %v1144_v0  ;;  %852 = vmatprep.subr.bf16.mxu1 %v1144_v0 }
  0x88   : > { %833 = vmatpush3.bf16.msra.mxu0 %v953_v11  ;;  %853 = vmatpush3.bf16.msra.mxu1 %v961_v17 }
  0x89   : > { %834 = vmatprep.subr.bf16.mxu0 %v1144_v0  ;;  %854 = vmatprep.subr.bf16.mxu1 %v1144_v0 }
  0x8c   : > { %835 = vmatpush3.bf16.msra.mxu0 %v954_v13  ;;  %855 = vmatpush3.bf16.msra.mxu1 %v962_v18 }
  0x8f   : > { %837 = vmatmul.mubr.bf16.vlgmr.msra.gmra.mrb[0].mxu0 %v372_v16 }
 0x162   : > { %v478_v20 = vpop.f32.mrb[0].mxu0 }
 0x163   : > { %v479_v21 = vadd.f32 %v778_v19, %v478_v20  ;;  %v838_v22 = vpop.f32.mrb[1].mxu0 }
 0x164   : > { %v481_v23 = vpop.f32.mrb[2].mxu0 }
 0x165   : > { %v484_v24 = vmax.f32 %v479_v21, 0.0  ;;  %v839_v25 = vpop.f32.mrb[3].mxu0 }
 0x167   : > { %v486_v26 = vpack.c.bf16 %v484_v24, %v484_v24 }
 0x169   : > { %857 = vmatmul.mubr.bf16.vlgmr.msra.gmra.mrb[0].mxu1 %v486_v26 }
 0x23c   : > { %v585_v28 = vpop.f32.mrb[0].mxu1 }
 0x23d   : > { %v604_v29 = vadd.f32 %v795_v27, %v585_v28  ;;  %v858_v30 = vpop.f32.mrb[1].mxu1 }
 0x23e   : > { %v588_v31 = vpop.f32.mrb[2].mxu1 }
 0x23f   : > { %v606_v32 = vadd.f32 %v604_v29, %v371_v14  ;;  %v859_v33 = vpop.f32.mrb[3].mxu1 }
 0x241   : > { %607 = vadd.xlane.f32.xlu0 %v606_v32  ;;  %v610_v34 = vmul.f32 %v606_v32, %v606_v32 }
 0x245   : > { %611 = vadd.xlane.f32.xlu0 %v610_v34 }
 0x2ce   : > { %v608_v35 = vpop.xlane.xlu0 %607 }
 0x2cf   : > { %v609_v36 = vmul.f32 0.03125, %v608_v35 }
 0x2d1   : > { %v614_v38 = vmul.f32 %v609_v36, %v609_v36  ;;  %v616_v42 = vsub.f32 %v606_v32, %v609_v36 }
 0x2d2   : > { %v612_v37 = vpop.xlane.xlu0 %611 }
 0x2d3   : > { %v613_v39 = vmul.f32 0.03125, %v612_v37 }
 0x2d5   : > { %v615_v40 = vsub.f32 %v613_v39, %v614_v38 }
 0x2d7   : > { %v617_v41 = vadd.f32 1e-06, %v615_v40 }
 0x2d9   : > { %963 = vrsqrt.f32 %v617_v41 }
 0x2e3   : > { %v964_v43 = vpop.eup %963 }
 0x2e4   : > { %v619_v45 = vmul.f32 %v964_v43, %v616_v42 }
 0x2e6   : > { %v627_v47 = vmul.f32 %v796_v44, %v619_v45 }
 0x2e8   : > { %v635_v48 = vadd.f32 %v797_v46, %v627_v47 }
 0x2ea   : > { %636 = vst [vmem:[%s360_s22] sm:$0xff] %v635_v48 }
 0x2eb   : > { %1064 = shalt.err (!%p1061_p11)
}
 0x2ec   : > { %s1065_s21 = scalar_lea.hbm %s1407_s9, 128  ;;  %s1069_s12 = scalar_lea.hbm %s1463_s7, 256 }
 0x2ed   : > { %p1066_p0 = scmp.ne.s32.totalorder %s1407_s9, %s1065_s21  ;;  %p1070_p6 = scmp.lt.u32.totalorder %s1407_s9, %s1463_s7 }
 0x2ee   : > { %p1071_p7 = scmp.lt.u32.totalorder %s1069_s12, %s1065_s21  ;;  %p1073_p8 = scmp.lt.u32.totalorder %s1065_s21, %s1407_s9 }
 0x2ef   : > { %p1067_p4 = pnand %p1066_p0, %p1482_p12 }
 0x2f0   : > { %p1072_p2 = por %p1071_p7, %p1070_p6 }
 0x2f1   : > { %p1068_p13 = pneg %p1067_p4 }
 0x2f2   : > { %p1074_p1 = por %p1073_p8, %p1072_p2 }
 0x2f4   : > { %p1075_p10 = pnand %p1074_p1, %p1068_p13 }
 0x2f6   : > { %1078 = shalt.err (!%p1075_p10)
}
 0x2f7   : > { %870 = dma.vmem_to_hbm [thread:$0]  (%p1482_p12), %s1409_s18, 128, %s1407_s9, %s638_s11  }
 0x2f8 PF: > { %s1483_s22 = sld [smem:[#allocation13_spill]]  ;;  %s1484_s30 = sld [smem:[#allocation14_spill]] }
 0x2f9   : > { %p1486_p5 = scmp.ge.s32.totalorder %s1137_s29, 2 }
 0x2fe   : > { %s663_s8 = sand.u32 1, %s1483_s22   ;;  %p1485_p3 = scmp.ne.s32.totalorder %s1484_s30, 0 }
 0x2ff   : > { %s664_s13 = scalar_lea.sflag [#allocation5], %s663_s8 }
 0x300   : > { %p884_p9 = pnand %p1486_p5, %p1485_p3 }
 0x302   : > { %1112 = dma.done.wait (!%p884_p9), %s664_s13, 128  }
 0x303   : > { %1114 = vsyncadd (!%p884_p9), %s664_s13, 4294967168  ;;  %s24_s29 = sadd.s32 1, %s1137_s29   ;;  %s1487_s24 = smov %s1121_s25 }
 0x304   : > { %p21_p11 = scmp.ge.s32.totalorder %s24_s29, 4   ;;  %s1488_s25 = smov %s1125_s26 }
 0x305   : > { %s1489_s26 = smov %s1329_s19  ;;  %s1490_s27 = smov %s1133_s28 }
 0x306   : > { %s1491_s28 = smov %s1493_s20  ;;  %23 = sbr.rel (!%p21_p11) target bundleno = 7 (0x7), region = 114 }
 0x30d   :  { %669 = vsyncpa [#allocation4], 1 }
 0x30e   :  { %671 = vsyncpa [#allocation4 + $0x1], 1 }
 0x30f   :  { %672 = vsyncpa [#allocation7], 1 }
 0x310   :  { %673 = vsyncpa [#allocation5], 1 }
 0x311   :  { %675 = vsyncpa [#allocation5 + $0x1], 1 }

</bundles_post_ra>
